<compile_context>
chip_gen: v7x
topology: tpu7x:2x2x1
jax: 0.10.0
libtpu: 0.0.40
codegen_flags: <defaults>
</compile_context>

<pallas_src>
import jax
import jax.numpy as jnp
from jax.experimental import pallas as pl
from jax.experimental.pallas import tpu as pltpu


def _round_up(x, m):
    return ((x + m - 1) // m) * m


def _sublane(dtype):
    """Sublane packing granularity: 8 rows for 4B, 16 for 2B, 32 for 1B."""
    s = jnp.dtype(dtype).itemsize
    if s >= 4:
        return 8
    return 32 // max(s, 1)


def _pick_tile(total, align, cap):
    """Largest multiple of `align` that divides `total` and is <= cap."""
    cap = min(cap, total)
    t = (cap // align) * align
    t = max(t, align)
    while t > align:
        if total % t == 0:
            return t
        t -= align
    return align


def _affine_kernel_direct(x_ref, w_ref, o_ref):
    """f32 output: accumulate straight into the K-resident output block."""
    k = pl.program_id(2)
    prod = jnp.dot(x_ref[...], w_ref[...], preferred_element_type=jnp.float32)

    @pl.when(k == 0)
    def _():
        o_ref[...] = prod

    @pl.when(k > 0)
    def _():
        o_ref[...] += prod


def _affine_kernel_acc(x_ref, w_ref, o_ref, acc_ref):
    """Non-f32 output: accumulate in an f32 scratch, cast on the last step."""
    k = pl.program_id(2)
    prod = jnp.dot(x_ref[...], w_ref[...], preferred_element_type=jnp.float32)

    @pl.when(k == 0)
    def _():
        acc_ref[...] = prod

    @pl.when(k > 0)
    def _():
        acc_ref[...] += prod

    @pl.when(k == pl.num_programs(2) - 1)
    def _():
        o_ref[...] = acc_ref[...].astype(o_ref.dtype)


@jax.jit
def affine_linear_forward(x, weight):
    """Pallas implementation of AffineLinear.forward.

    x:      (M, K) or (N, C, H, W) -> flattened row-major to (M, K)
    weight: (N_out, K)             -> out = x @ weight.T, shape (M, N_out)
    """
    if x.ndim == 4:
        # convert4to2: contiguous row-major flatten of (C, H, W) per example.
        x = x.reshape(x.shape[0], -1)
    assert x.ndim == 2
    M, K = x.shape
    N, Kw = weight.shape
    assert Kw == K

    # Match dtypes (PyTorch-style: same compute dtype for both operands).
    if x.dtype != weight.dtype:
        cdt = jnp.result_type(x.dtype, weight.dtype)
        x = x.astype(cdt)
        weight = weight.astype(cdt)
    out_dtype = x.dtype

    x_b = jnp.dtype(x.dtype).itemsize
    w_b = jnp.dtype(weight.dtype).itemsize
    o_b = jnp.dtype(out_dtype).itemsize

    # ---- Padded (aligned) problem sizes: minimal, not tile-sized. ----------
    sub = _sublane(out_dtype)
    Mp = _round_up(M, sub)
    Np = _round_up(N, 128)
    Kp = _round_up(K, 128)

    # ---- Generation-aware VMEM budget. -------------------------------------
    try:
        vmem_cap = int(pltpu.get_tpu_info().vmem_capacity_bytes)
    except Exception:
        vmem_cap = 64 << 20  # conservative (v7x) fallback
    budget = (vmem_cap * 3) // 4

    direct = out_dtype == jnp.float32

    # ---- Tile selection. ----------------------------------------------------
    # Small-M (batch-GEMV) regime: one M tile so the weight streams exactly
    # once; otherwise the largest divisor of Mp up to 512.
    if Mp <= 512:
        tm = Mp
    else:
        tm = _pick_tile(Mp, sub, 512)
    tn = _pick_tile(Np, 128, 1024)
    tk = _pick_tile(Kp, 128, 2048)

    def footprint(tm_, tn_, tk_):
        b = 2 * (tm_ * tk_ * x_b + tk_ * tn_ * w_b + tm_ * tn_ * o_b)
        if not direct:
            b += tm_ * tn_ * 4
        return b

    # Shrink until the double-buffered tiles fit the budget (v7x has only
    # 64 MiB VMEM; v5e/v6e keep the big tiles).
    while footprint(tm, tn, tk) > budget:
        if tk > 128:
            tk = _pick_tile(Kp, 128, tk // 2)
        elif tn > 128:
            tn = _pick_tile(Np, 128, tn // 2)
        elif tm > sub:
            tm = _pick_tile(Mp, sub, max(sub, tm // 2))
        else:
            break

    # Megacore (v7x has 2 TCs): make sure the parallel (M, N) grid has >= 2
    # blocks when N allows it. x re-reads only grow by the N split, which is
    # negligible in the small-M regime where this triggers.
    if (Mp // tm) * (Np // tn) < 2 and Np >= 256:
        tn = _pick_tile(Np, 128, Np // 2)

    grid = (Mp // tm, Np // tn, Kp // tk)

    # ---- Operand prep: transpose weight once, pad only what's needed. ------
    if (Mp, Kp) != (M, K):
        x = jnp.pad(x, ((0, Mp - M), (0, Kp - K)))
    w_t = weight.T  # (K, N) so the kernel contraction is a plain A @ B.
    if (Kp, Np) != (K, N):
        w_t = jnp.pad(w_t, ((0, Kp - K), (0, Np - N)))

    kernel = _affine_kernel_direct if direct else _affine_kernel_acc
    scratch = [] if direct else [pltpu.VMEM((tm, tn), jnp.float32)]

    vmem_limit = int(min(budget, footprint(tm, tn, tk) + (4 << 20)))

    # Advisory cost: actual streamed traffic (operand re-reads included).
    cost = pl.CostEstimate(
        flops=2 * M * N * K,
        transcendentals=0,
        bytes_accessed=(M * K * x_b * (Np // tn)
                        + K * N * w_b * (Mp // tm)
                        + M * N * o_b),
    )

    out = pl.pallas_call(
        kernel,
        out_shape=jax.ShapeDtypeStruct((Mp, Np), out_dtype),
        grid_spec=pltpu.PrefetchScalarGridSpec(
            num_scalar_prefetch=0,
            grid=grid,
            in_specs=[
                # x tile: (tm, tk) block at grid (i, k).
                pl.BlockSpec((tm, tk), lambda i, j, k: (i, k)),
                # weight tile, pre-transposed (K, N) layout: (tk, tn) at (k, j).
                pl.BlockSpec((tk, tn), lambda i, j, k: (k, j)),
            ],
            # Output block resident across the K (reduction) axis.
            out_specs=pl.BlockSpec((tm, tn), lambda i, j, k: (i, j)),
            scratch_shapes=scratch,
        ),
        compiler_params=pltpu.CompilerParams(
            dimension_semantics=("parallel", "parallel", "arbitrary"),
            vmem_limit_bytes=vmem_limit,
        ),
        cost_estimate=cost,
    )(x, w_t)

    if (Mp, Np) != (M, N):
        out = out[:M, :N]
    return out


if __name__ == "__main__":
    key = jax.random.PRNGKey(0)
    kx, kw = jax.random.split(key)

    # Small shapes consistent with the module: a 4-D NCHW activation feeding
    # an nn.Linear(in_features=C*H*W, out_features=32, bias=False).
    B, C, H, W = 2, 4, 16, 16
    in_features = C * H * W          # 1024
    out_features = 32

    x = jax.random.normal(kx, (B, C, H, W), dtype=jnp.float32)

    # Deterministic weight init (PyTorch-style uniform(-1/sqrt(fan_in), ...)).
    bound = 1.0 / jnp.sqrt(jnp.float32(in_features))
    weight = jax.random.uniform(
        kw, (out_features, in_features), dtype=jnp.float32,
        minval=-bound, maxval=bound,
    )

    out = affine_linear_forward(x, weight)
    out = jax.block_until_ready(out)

    # Pure-JAX reference for correctness.
    ref = jnp.dot(x.reshape(B, -1), weight.T)
    assert out.shape == (B, out_features)
    assert jnp.allclose(out, ref, atol=1e-5, rtol=1e-5)

    print("KERNEL_OK")
</pallas_src>

<mosaic_0001>
module attributes {stable_mosaic.version = 11 : i64} {
  func.func @_affine_kernel_direct(%arg0: i32, %arg1: i32, %arg2: i32, %arg3: memref<8x1024xf32, #tpu.memory_space<vmem>>, %arg4: memref<1024x128xf32, #tpu.memory_space<vmem>>, %arg5: memref<8x128xf32, #tpu.memory_space<vmem>>) attributes {dimension_semantics = [#tpu.dimension_semantics<parallel>, #tpu.dimension_semantics<parallel>, #tpu.dimension_semantics<arbitrary>], iteration_bounds = array<i64: 1, 1, 1>, scalar_prefetch = 0 : i64, scratch_operands = 0 : i64, tpu.core_type = #tpu.core_type<tc>, window_params = [{transform_indices = @transform_0, window_bounds = array<i64: 8, 1024>}, {transform_indices = @transform_1, window_bounds = array<i64: 1024, 128>}, {transform_indices = @transform_2, window_bounds = array<i64: 8, 128>}]} {
    %c0 = arith.constant 0 : index
    %c0_0 = arith.constant 0 : index
    %0 = vector.load %arg3[%c0, %c0_0] : memref<8x1024xf32, #tpu.memory_space<vmem>>, vector<8x1024xf32>
    %c0_1 = arith.constant 0 : index
    %c0_2 = arith.constant 0 : index
    %1 = vector.load %arg4[%c0_1, %c0_2] : memref<1024x128xf32, #tpu.memory_space<vmem>>, vector<1024x128xf32>
    %cst = arith.constant dense<0.000000e+00> : vector<8x128xf32>
    %2 = tpu.matmul %0, %1, %cst {dimension_numbers = #tpu.dot_dimension_numbers<[1], [0], [0], [1], [0, 0, 1, 1], [], []>} : vector<8x1024xf32>, vector<1024x128xf32>, vector<8x128xf32> -> vector<8x128xf32>
    %c0_i32 = arith.constant 0 : i32
    %3 = arith.cmpi eq, %arg2, %c0_i32 : i32
    %4 = arith.extui %3 : i1 to i32
    %c0_i32_3 = arith.constant 0 : i32
    %5 = arith.cmpi ne, %4, %c0_i32_3 : i32
    scf.if %5 {
      %c0_6 = arith.constant 0 : index
      %c0_7 = arith.constant 0 : index
      %9 = vector.load %arg5[%c0_6, %c0_7] : memref<8x128xf32, #tpu.memory_space<vmem>>, vector<8x128xf32>
      tpu.vector_store %arg5[%c0_6, %c0_7], %2 {strides = array<i32>} : memref<8x128xf32, #tpu.memory_space<vmem>>, vector<8x128xf32>,
    } else {
    }
    %c0_i32_4 = arith.constant 0 : i32
    %6 = arith.cmpi sgt, %arg2, %c0_i32_4 : i32
    %7 = arith.extui %6 : i1 to i32
    %c0_i32_5 = arith.constant 0 : i32
    %8 = arith.cmpi ne, %7, %c0_i32_5 : i32
    scf.if %8 {
      %c0_6 = arith.constant 0 : index
      %c0_7 = arith.constant 0 : index
      %9 = vector.load %arg5[%c0_6, %c0_7] : memref<8x128xf32, #tpu.memory_space<vmem>>, vector<8x128xf32>
      %10 = arith.addf %9, %2 : vector<8x128xf32>
      %c0_8 = arith.constant 0 : index
      %c0_9 = arith.constant 0 : index
      %11 = vector.load %arg5[%c0_8, %c0_9] : memref<8x128xf32, #tpu.memory_space<vmem>>, vector<8x128xf32>
      tpu.vector_store %arg5[%c0_8, %c0_9], %10 {strides = array<i32>} : memref<8x128xf32, #tpu.memory_space<vmem>>, vector<8x128xf32>,
    } else {
    }
    return
  }
  func.func @transform_0(%arg0: i32, %arg1: i32, %arg2: i32) -> (i32, i32) {
    %c0_i32 = arith.constant 0 : i32
    return %arg0, %arg2 : i32, i32
  }
  func.func @transform_1(%arg0: i32, %arg1: i32, %arg2: i32) -> (i32, i32) {
    %c0_i32 = arith.constant 0 : i32
    return %arg2, %arg1 : i32, i32
  }
  func.func @transform_2(%arg0: i32, %arg1: i32, %arg2: i32) -> (i32, i32) {
    %c0_i32 = arith.constant 0 : i32
    return %arg0, %arg1 : i32, i32
  }
}

</mosaic_0001>

<bundles_post_ra>
// kernel: affine_linear_forward.1
= control target key start
LH: loop header
LB: loop body
LE: loop exit
PB: predicated region body
PF: predicated region fallthrough
CT: control target
= control target key end

     0   :  { %s1137_s1 = inlined_call_operand.vmem [shape: f32[1024,128], index: 1, kind: input, shape index: {}]   ;;  %s1138_s0 = inlined_call_operand.vmem [shape: f32[8,1024], index: 0, kind: input, shape index: {}]   ;;  %s1139_s2 = inlined_call_operand.vmem [shape: f32[8,128], index: 2, kind: output, shape index: {}]  }
   0x1   :  { %v35_v0 = vld [vmem:[%s1137_s1 + $0x80] sm:$0xff]  ;;  %v36_v1 = vld [vmem:[%s1137_s1 + $0x88] sm:$0xff]  ;;  %v37_v11 = vld [vmem:[%s1137_s1 + $0x90] sm:$0xff] }
   0x2   :  { %v67_v2 = vld [vmem:[%s1137_s1 + $0x180] sm:$0xff]  ;;  %v583_v3 = vpack.c.bf16 %v36_v1, %v35_v0  ;;  %v68_v4 = vld [vmem:[%s1137_s1 + $0x188] sm:$0xff]  ;;  %v38_v13 = vld [vmem:[%s1137_s1 + $0x98] sm:$0xff] }
   0x3   :  { %v19_v5 = vld [vmem:[%s1137_s1] sm:$0xff]  ;;  %v20_v6 = vld [vmem:[%s1137_s1 + $0x8] sm:$0xff]  ;;  %v615_v7 = vpack.c.bf16 %v68_v4, %v67_v2  ;;  %v69_v14 = vld [vmem:[%s1137_s1 + $0x190] sm:$0xff]  ;;  %v587_v16 = vpack.c.bf16 %v38_v13, %v37_v11 }
   0x4   :  { %v585_v8 = vpack.c.bf16 %v20_v6, %v19_v5  ;;  %v51_v9 = vld [vmem:[%s1137_s1 + $0x100] sm:$0xff]  ;;  %v52_v10 = vld [vmem:[%s1137_s1 + $0x108] sm:$0xff]  ;;  %584 = vmatprep.subr.bf16.mxu0 %v583_v3  ;;  %v70_v15 = vld [vmem:[%s1137_s1 + $0x198] sm:$0xff] }
   0x5   :  { %v617_v12 = vpack.c.bf16 %v52_v10, %v51_v9  ;;  %616 = vmatprep.subr.bf16.mxu1 %v615_v7  ;;  %v619_v17 = vpack.c.bf16 %v70_v15, %v69_v14  ;;  %v21_v18 = vld [vmem:[%s1137_s1 + $0x10] sm:$0xff]  ;;  %v22_v19 = vld [vmem:[%s1137_s1 + $0x18] sm:$0xff]  ;;  %v39_v23 = vld [vmem:[%s1137_s1 + $0xa0] sm:$0xff] }
   0x6   :  { %586 = vmatpush3.bf16.msra.mxu0 %v585_v8  ;;  %v53_v20 = vld [vmem:[%s1137_s1 + $0x110] sm:$0xff]  ;;  %v589_v21 = vpack.c.bf16 %v22_v19, %v21_v18  ;;  %v54_v22 = vld [vmem:[%s1137_s1 + $0x118] sm:$0xff]  ;;  %v40_v24 = vld [vmem:[%s1137_s1 + $0xa8] sm:$0xff] }
   0x7   :  { %618 = vmatpush3.bf16.msra.mxu1 %v617_v12  ;;  %588 = vmatprep.subr.bf16.mxu0 %v587_v16  ;;  %v621_v25 = vpack.c.bf16 %v54_v22, %v53_v20  ;;  %v591_v26 = vpack.c.bf16 %v40_v24, %v39_v23  ;;  %v71_v27 = vld [vmem:[%s1137_s1 + $0x1a0] sm:$0xff]  ;;  %v72_v28 = vld [vmem:[%s1137_s1 + $0x1a8] sm:$0xff]  ;;  %v41_v35 = vld [vmem:[%s1137_s1 + $0xb0] sm:$0xff] }
   0x8   :  { %620 = vmatprep.subr.bf16.mxu1 %v619_v17  ;;  %v23_v29 = vld [vmem:[%s1137_s1 + $0x20] sm:$0xff]  ;;  %v623_v30 = vpack.c.bf16 %v72_v28, %v71_v27  ;;  %v24_v31 = vld [vmem:[%s1137_s1 + $0x28] sm:$0xff]  ;;  %v42_v36 = vld [vmem:[%s1137_s1 + $0xb8] sm:$0xff] }
   0x9   :  { %v55_v32 = vld [vmem:[%s1137_s1 + $0x120] sm:$0xff]  ;;  %v56_v33 = vld [vmem:[%s1137_s1 + $0x128] sm:$0xff]  ;;  %v593_v34 = vpack.c.bf16 %v24_v31, %v23_v29  ;;  %v73_v37 = vld [vmem:[%s1137_s1 + $0x1b0] sm:$0xff]  ;;  %v595_v39 = vpack.c.bf16 %v42_v36, %v41_v35 }
   0xa   :  { %590 = vmatpush3.bf16.msra.mxu0 %v589_v21  ;;  %v625_v38 = vpack.c.bf16 %v56_v33, %v55_v32  ;;  %v74_v40 = vld [vmem:[%s1137_s1 + $0x1b8] sm:$0xff]  ;;  %v25_v41 = vld [vmem:[%s1137_s1 + $0x30] sm:$0xff]  ;;  %v43_v46 = vld [vmem:[%s1137_s1 + $0xc0] sm:$0xff] }
   0xb   :  { %622 = vmatpush3.bf16.msra.mxu1 %v621_v25  ;;  %592 = vmatprep.subr.bf16.mxu0 %v591_v26  ;;  %v26_v42 = vld [vmem:[%s1137_s1 + $0x38] sm:$0xff]  ;;  %v627_v43 = vpack.c.bf16 %v74_v40, %v73_v37  ;;  %v57_v44 = vld [vmem:[%s1137_s1 + $0x130] sm:$0xff]  ;;  %v44_v47 = vld [vmem:[%s1137_s1 + $0xc8] sm:$0xff] }
   0xc   :  { %624 = vmatprep.subr.bf16.mxu1 %v623_v30  ;;  %v58_v45 = vld [vmem:[%s1137_s1 + $0x138] sm:$0xff]  ;;  %v75_v48 = vld [vmem:[%s1137_s1 + $0x1c0] sm:$0xff]  ;;  %v76_v49 = vld [vmem:[%s1137_s1 + $0x1c8] sm:$0xff]  ;;  %v597_v50 = vpack.c.bf16 %v26_v42, %v25_v41  ;;  %v599_v52 = vpack.c.bf16 %v44_v47, %v43_v46 }
   0xd   :  { %v629_v51 = vpack.c.bf16 %v58_v45, %v57_v44  ;;  %v27_v53 = vld [vmem:[%s1137_s1 + $0x40] sm:$0xff]  ;;  %v28_v54 = vld [vmem:[%s1137_s1 + $0x48] sm:$0xff]  ;;  %v631_v56 = vpack.c.bf16 %v76_v49, %v75_v48  ;;  %v45_v58 = vld [vmem:[%s1137_s1 + $0xd0] sm:$0xff] }
   0xe   :  { %594 = vmatpush3.bf16.msra.mxu0 %v593_v34  ;;  %v59_v55 = vld [vmem:[%s1137_s1 + $0x140] sm:$0xff]  ;;  %v60_v57 = vld [vmem:[%s1137_s1 + $0x148] sm:$0xff]  ;;  %v46_v59 = vld [vmem:[%s1137_s1 + $0xd8] sm:$0xff]  ;;  %v601_v62 = vpack.c.bf16 %v28_v54, %v27_v53 }
   0xf   :  { %626 = vmatpush3.bf16.msra.mxu1 %v625_v38  ;;  %596 = vmatprep.subr.bf16.mxu0 %v595_v39  ;;  %v77_v60 = vld [vmem:[%s1137_s1 + $0x1d0] sm:$0xff]  ;;  %v78_v61 = vld [vmem:[%s1137_s1 + $0x1d8] sm:$0xff]  ;;  %v633_v63 = vpack.c.bf16 %v60_v57, %v59_v55  ;;  %v603_v0 = vpack.c.bf16 %v46_v59, %v45_v58  ;;  %v47_v6 = vld [vmem:[%s1137_s1 + $0xe0] sm:$0xff] }
  0x10   :  { %628 = vmatprep.subr.bf16.mxu1 %v627_v43  ;;  %v29_v1 = vld [vmem:[%s1137_s1 + $0x50] sm:$0xff]  ;;  %v30_v2 = vld [vmem:[%s1137_s1 + $0x58] sm:$0xff]  ;;  %v635_v4 = vpack.c.bf16 %v78_v61, %v77_v60  ;;  %v48_v7 = vld [vmem:[%s1137_s1 + $0xe8] sm:$0xff] }
  0x11   :  { %v61_v3 = vld [vmem:[%s1137_s1 + $0x150] sm:$0xff]  ;;  %v62_v5 = vld [vmem:[%s1137_s1 + $0x158] sm:$0xff]  ;;  %v79_v8 = vld [vmem:[%s1137_s1 + $0x1e0] sm:$0xff]  ;;  %v605_v10 = vpack.c.bf16 %v30_v2, %v29_v1  ;;  %v607_v14 = vpack.c.bf16 %v48_v7, %v47_v6 }
  0x12   :  { %598 = vmatpush3.bf16.msra.mxu0 %v597_v50  ;;  %v80_v9 = vld [vmem:[%s1137_s1 + $0x1e8] sm:$0xff]  ;;  %v31_v11 = vld [vmem:[%s1137_s1 + $0x60] sm:$0xff]  ;;  %v637_v13 = vpack.c.bf16 %v62_v5, %v61_v3  ;;  %v14_v17 = vld [vmem:[%s1138_s0 + $0x18] sm:$0xff] }
  0x13   :  { %630 = vmatpush3.bf16.msra.mxu1 %v629_v51  ;;  %600 = vmatprep.subr.bf16.mxu0 %v599_v52  ;;  %v32_v12 = vld [vmem:[%s1137_s1 + $0x68] sm:$0xff]  ;;  %v63_v15 = vld [vmem:[%s1137_s1 + $0x160] sm:$0xff]  ;;  %v639_v18 = vpack.c.bf16 %v80_v9, %v79_v8  ;;  %v49_v20 = vld [vmem:[%s1137_s1 + $0xf0] sm:$0xff] }
  0x14   :  { %632 = vmatprep.subr.bf16.mxu1 %v631_v56  ;;  %v12_v16 = vld [vmem:[%s1138_s0 + $0x8] sm:$0xff]  ;;  %v50_v21 = vld [vmem:[%s1137_s1 + $0xf8] sm:$0xff]  ;;  %v81_v22 = vld [vmem:[%s1137_s1 + $0x1f0] sm:$0xff]  ;;  %281 = vmatprep.mubr.f32.mxu1 %v14_v17  ;;  %v609_v24 = vpack.c.bf16 %v32_v12, %v31_v11 }
  0x15   :  { %v64_v19 = vld [vmem:[%s1137_s1 + $0x168] sm:$0xff]  ;;  %211 = vmatprep.mubr.f32.mxu0 %v12_v16  ;;  %v82_v23 = vld [vmem:[%s1137_s1 + $0x1f8] sm:$0xff]  ;;  %v611_v26 = vpack.c.bf16 %v50_v21, %v49_v20  ;;  %v33_v27 = vld [vmem:[%s1137_s1 + $0x70] sm:$0xff] }
  0x16   :  { %602 = vmatpush3.bf16.msra.mxu0 %v601_v62  ;;  %v641_v25 = vpack.c.bf16 %v64_v19, %v63_v15  ;;  %v34_v28 = vld [vmem:[%s1137_s1 + $0x78] sm:$0xff]  ;;  %v65_v29 = vld [vmem:[%s1137_s1 + $0x170] sm:$0xff]  ;;  %v643_v30 = vpack.c.bf16 %v82_v23, %v81_v22  ;;  %v99_v32 = vld [vmem:[%s1137_s1 + $0x280] sm:$0xff] }
  0x17   :  { %634 = vmatpush3.bf16.msra.mxu1 %v633_v63  ;;  %604 = vmatprep.subr.bf16.mxu0 %v603_v0  ;;  %v66_v31 = vld [vmem:[%s1137_s1 + $0x178] sm:$0xff]  ;;  %v100_v33 = vld [vmem:[%s1137_s1 + $0x288] sm:$0xff]  ;;  %v131_v34 = vld [vmem:[%s1137_s1 + $0x380] sm:$0xff]  ;;  %v613_v36 = vpack.c.bf16 %v34_v28, %v33_v27 }
  0x18   :  { %636 = vmatprep.subr.bf16.mxu1 %v635_v4  ;;  %v132_v35 = vld [vmem:[%s1137_s1 + $0x388] sm:$0xff]  ;;  %v645_v37 = vpack.c.bf16 %v66_v31, %v65_v29  ;;  %v647_v38 = vpack.c.bf16 %v100_v33, %v99_v32  ;;  %v83_v39 = vld [vmem:[%s1137_s1 + $0x200] sm:$0xff]  ;;  %v101_v44 = vld [vmem:[%s1137_s1 + $0x290] sm:$0xff] }
  0x19   :  { %v84_v40 = vld [vmem:[%s1137_s1 + $0x208] sm:$0xff]  ;;  %v115_v41 = vld [vmem:[%s1137_s1 + $0x300] sm:$0xff]  ;;  %v679_v42 = vpack.c.bf16 %v132_v35, %v131_v34  ;;  %v102_v45 = vld [vmem:[%s1137_s1 + $0x298] sm:$0xff] }
  0x1a   :  { %606 = vmatpush3.bf16.msra.mxu0 %v605_v10  ;;  %v116_v43 = vld [vmem:[%s1137_s1 + $0x308] sm:$0xff]  ;;  %v133_v46 = vld [vmem:[%s1137_s1 + $0x390] sm:$0xff]  ;;  %v134_v47 = vld [vmem:[%s1137_s1 + $0x398] sm:$0xff]  ;;  %v649_v50 = vpack.c.bf16 %v84_v40, %v83_v39  ;;  %v651_v52 = vpack.c.bf16 %v102_v45, %v101_v44 }
  0x1b   :  { %638 = vmatpush3.bf16.msra.mxu1 %v637_v13  ;;  %608 = vmatprep.subr.bf16.mxu0 %v607_v14  ;;  %v11_v48 = vld [vmem:[%s1138_s0] sm:$0xff]  ;;  %v13_v49 = vld [vmem:[%s1138_s0 + $0x10] sm:$0xff]  ;;  %v681_v51 = vpack.c.bf16 %v116_v43, %v115_v41  ;;  %v86_v54 = vld [vmem:[%s1137_s1 + $0x218] sm:$0xff]  ;;  %v683_v56 = vpack.c.bf16 %v134_v47, %v133_v46 }
  0x1c   :  { %640 = vmatprep.subr.bf16.mxu1 %v639_v18  ;;  %v85_v53 = vld [vmem:[%s1137_s1 + $0x210] sm:$0xff]  ;;  %v118_v57 = vld [vmem:[%s1137_s1 + $0x318] sm:$0xff]  ;;  %v103_v58 = vld [vmem:[%s1137_s1 + $0x2a0] sm:$0xff] }
  0x1d   :  { %v117_v55 = vld [vmem:[%s1137_s1 + $0x310] sm:$0xff]  ;;  %v104_v59 = vld [vmem:[%s1137_s1 + $0x2a8] sm:$0xff]  ;;  %v135_v60 = vld [vmem:[%s1137_s1 + $0x3a0] sm:$0xff]  ;;  %v653_v62 = vpack.c.bf16 %v86_v54, %v85_v53 }
  0x1e   :  { %610 = vmatpush3.bf16.msra.mxu0 %v609_v24  ;;  %v136_v61 = vld [vmem:[%s1137_s1 + $0x3a8] sm:$0xff]  ;;  %v685_v63 = vpack.c.bf16 %v118_v57, %v117_v55  ;;  %v655_v0 = vpack.c.bf16 %v104_v59, %v103_v58  ;;  %v87_v1 = vld [vmem:[%s1137_s1 + $0x220] sm:$0xff]  ;;  %v105_v6 = vld [vmem:[%s1137_s1 + $0x2b0] sm:$0xff] }
  0x1f   :  { %642 = vmatpush3.bf16.msra.mxu1 %v641_v25  ;;  %612 = vmatprep.subr.bf16.mxu0 %v611_v26  ;;  %v88_v2 = vld [vmem:[%s1137_s1 + $0x228] sm:$0xff]  ;;  %v119_v3 = vld [vmem:[%s1137_s1 + $0x320] sm:$0xff]  ;;  %v687_v4 = vpack.c.bf16 %v136_v61, %v135_v60  ;;  %v106_v7 = vld [vmem:[%s1137_s1 + $0x2b8] sm:$0xff] }
  0x20   :  { %644 = vmatprep.subr.bf16.mxu1 %v643_v30  ;;  %v120_v5 = vld [vmem:[%s1137_s1 + $0x328] sm:$0xff]  ;;  %v137_v8 = vld [vmem:[%s1137_s1 + $0x3b0] sm:$0xff]  ;;  %v138_v9 = vld [vmem:[%s1137_s1 + $0x3b8] sm:$0xff]  ;;  %v657_v10 = vpack.c.bf16 %v88_v2, %v87_v1  ;;  %v659_v12 = vpack.c.bf16 %v106_v7, %v105_v6 }
  0x21   :  { %v689_v11 = vpack.c.bf16 %v120_v5, %v119_v3  ;;  %v89_v13 = vld [vmem:[%s1137_s1 + $0x230] sm:$0xff]  ;;  %v90_v14 = vld [vmem:[%s1137_s1 + $0x238] sm:$0xff]  ;;  %v691_v16 = vpack.c.bf16 %v138_v9, %v137_v8  ;;  %v107_v18 = vld [vmem:[%s1137_s1 + $0x2c0] sm:$0xff] }
  0x22   :  { %614 = vmatpush3.bf16.msra.mxu0 %v613_v36  ;;  %v121_v15 = vld [vmem:[%s1137_s1 + $0x330] sm:$0xff]  ;;  %v122_v17 = vld [vmem:[%s1137_s1 + $0x338] sm:$0xff]  ;;  %v108_v19 = vld [vmem:[%s1137_s1 + $0x2c8] sm:$0xff]  ;;  %v661_v22 = vpack.c.bf16 %v90_v14, %v89_v13 }
  0x23   :  { %646 = vmatpush3.bf16.msra.mxu1 %v645_v37  ;;  %648 = vmatprep.subr.bf16.mxu0 %v647_v38  ;;  %v139_v20 = vld [vmem:[%s1137_s1 + $0x3c0] sm:$0xff]  ;;  %v140_v21 = vld [vmem:[%s1137_s1 + $0x3c8] sm:$0xff]  ;;  %v18_v24 = vld [vmem:[%s1138_s0 + $0x38] sm:$0xff]  ;;  %v693_v25 = vpack.c.bf16 %v122_v17, %v121_v15  ;;  %v663_v26 = vpack.c.bf16 %v108_v19, %v107_v18 }
  0x24   :  { %680 = vmatprep.subr.bf16.mxu1 %v679_v42  ;;  %v16_v23 = vld [vmem:[%s1138_s0 + $0x28] sm:$0xff]  ;;  %v91_v27 = vld [vmem:[%s1137_s1 + $0x240] sm:$0xff]  ;;  %v695_v30 = vpack.c.bf16 %v140_v21, %v139_v20  ;;  %v109_v32 = vld [vmem:[%s1137_s1 + $0x2d0] sm:$0xff] }
  0x25   :  { %212 = vmatmul.mubr.f32.vlgmr.msra.gmra.mrb[0].mxu0 %v11_v48  ;;  %v92_v28 = vld [vmem:[%s1137_s1 + $0x248] sm:$0xff]  ;;  %v123_v29 = vld [vmem:[%s1137_s1 + $0x340] sm:$0xff]  ;;  %v110_v33 = vld [vmem:[%s1137_s1 + $0x2d8] sm:$0xff] }
  0x26   :  { %282 = vmatmul.mubr.f32.vlgmr.msra.gmra.mrb[0].mxu1 %v13_v49  ;;  %650 = vmatpush3.bf16.msra.mxu0 %v649_v50  ;;  %v124_v31 = vld [vmem:[%s1137_s1 + $0x348] sm:$0xff]  ;;  %v141_v34 = vld [vmem:[%s1137_s1 + $0x3d0] sm:$0xff]  ;;  %v142_v35 = vld [vmem:[%s1137_s1 + $0x3d8] sm:$0xff]  ;;  %v665_v36 = vpack.c.bf16 %v92_v28, %v91_v27  ;;  %v667_v38 = vpack.c.bf16 %v110_v33, %v109_v32 }
  0x27   :  { %682 = vmatpush3.bf16.msra.mxu1 %v681_v51  ;;  %652 = vmatprep.subr.bf16.mxu0 %v651_v52  ;;  %v697_v37 = vpack.c.bf16 %v124_v31, %v123_v29  ;;  %v93_v39 = vld [vmem:[%s1137_s1 + $0x250] sm:$0xff]  ;;  %v94_v40 = vld [vmem:[%s1137_s1 + $0x258] sm:$0xff]  ;;  %v699_v42 = vpack.c.bf16 %v142_v35, %v141_v34  ;;  %v111_v44 = vld [vmem:[%s1137_s1 + $0x2e0] sm:$0xff] }
  0x28   :  { %684 = vmatprep.subr.bf16.mxu1 %v683_v56  ;;  %351 = vmatprep.mubr.f32.mxu0 %v16_v23  ;;  %v125_v41 = vld [vmem:[%s1137_s1 + $0x350] sm:$0xff]  ;;  %v126_v43 = vld [vmem:[%s1137_s1 + $0x358] sm:$0xff]  ;;  %v112_v45 = vld [vmem:[%s1137_s1 + $0x2e8] sm:$0xff]  ;;  %v669_v48 = vpack.c.bf16 %v94_v40, %v93_v39 }
  0x29   :  { %421 = vmatprep.mubr.f32.mxu1 %v18_v24  ;;  %v143_v46 = vld [vmem:[%s1137_s1 + $0x3e0] sm:$0xff]  ;;  %v144_v47 = vld [vmem:[%s1137_s1 + $0x3e8] sm:$0xff]  ;;  %v701_v49 = vpack.c.bf16 %v126_v43, %v125_v41  ;;  %v671_v50 = vpack.c.bf16 %v112_v45, %v111_v44  ;;  %v113_v56 = vld [vmem:[%s1137_s1 + $0x2f0] sm:$0xff] }
  0x2a   :  { %654 = vmatpush3.bf16.msra.mxu0 %v653_v62  ;;  %v95_v51 = vld [vmem:[%s1137_s1 + $0x260] sm:$0xff]  ;;  %v96_v52 = vld [vmem:[%s1137_s1 + $0x268] sm:$0xff]  ;;  %v703_v54 = vpack.c.bf16 %v144_v47, %v143_v46  ;;  %v114_v57 = vld [vmem:[%s1137_s1 + $0x2f8] sm:$0xff] }
  0x2b   :  { %686 = vmatpush3.bf16.msra.mxu1 %v685_v63  ;;  %656 = vmatprep.subr.bf16.mxu0 %v655_v0  ;;  %v127_v53 = vld [vmem:[%s1137_s1 + $0x360] sm:$0xff]  ;;  %v128_v55 = vld [vmem:[%s1137_s1 + $0x368] sm:$0xff]  ;;  %v145_v58 = vld [vmem:[%s1137_s1 + $0x3f0] sm:$0xff]  ;;  %v673_v60 = vpack.c.bf16 %v96_v52, %v95_v51  ;;  %v675_v62 = vpack.c.bf16 %v114_v57, %v113_v56 }
  0x2c   :  { %688 = vmatprep.subr.bf16.mxu1 %v687_v4  ;;  %v146_v59 = vld [vmem:[%s1137_s1 + $0x3f8] sm:$0xff]  ;;  %v705_v61 = vpack.c.bf16 %v128_v55, %v127_v53  ;;  %v97_v63 = vld [vmem:[%s1137_s1 + $0x270] sm:$0xff]  ;;  %v15_v6 = vld [vmem:[%s1138_s0 + $0x20] sm:$0xff] }
  0x2d   :  { %v98_v0 = vld [vmem:[%s1137_s1 + $0x278] sm:$0xff]  ;;  %v707_v1 = vpack.c.bf16 %v146_v59, %v145_v58  ;;  %v129_v2 = vld [vmem:[%s1137_s1 + $0x370] sm:$0xff] }
  0x2e   :  { %658 = vmatpush3.bf16.msra.mxu0 %v657_v10  ;;  %v130_v3 = vld [vmem:[%s1137_s1 + $0x378] sm:$0xff]  ;;  %v677_v4 = vpack.c.bf16 %v98_v0, %v97_v63  ;;  %v17_v7 = vld [vmem:[%s1138_s0 + $0x30] sm:$0xff] }
  0x2f   :  { %690 = vmatpush3.bf16.msra.mxu1 %v689_v11  ;;  %660 = vmatprep.subr.bf16.mxu0 %v659_v12  ;;  %v709_v5 = vpack.c.bf16 %v130_v3, %v129_v2 }
  0x30   :  { %692 = vmatprep.subr.bf16.mxu1 %v691_v16 }
  0x32   :  { %662 = vmatpush3.bf16.msra.mxu0 %v661_v22 }
  0x33   :  { %694 = vmatpush3.bf16.msra.mxu1 %v693_v25  ;;  %664 = vmatprep.subr.bf16.mxu0 %v663_v26 }
  0x34   :  { %696 = vmatprep.subr.bf16.mxu1 %v695_v30 }
  0x36   :  { %666 = vmatpush3.bf16.msra.mxu0 %v665_v36 }
  0x37   :  { %698 = vmatpush3.bf16.msra.mxu1 %v697_v37  ;;  %668 = vmatprep.subr.bf16.mxu0 %v667_v38 }
  0x38   :  { %700 = vmatprep.subr.bf16.mxu1 %v699_v42 }
  0x3a   :  { %670 = vmatpush3.bf16.msra.mxu0 %v669_v48 }
  0x3b   :  { %702 = vmatpush3.bf16.msra.mxu1 %v701_v49  ;;  %672 = vmatprep.subr.bf16.mxu0 %v671_v50 }
  0x3c   :  { %704 = vmatprep.subr.bf16.mxu1 %v703_v54 }
  0x3e   :  { %674 = vmatpush3.bf16.msra.mxu0 %v673_v60 }
  0x3f   :  { %706 = vmatpush3.bf16.msra.mxu1 %v705_v61  ;;  %676 = vmatprep.subr.bf16.mxu0 %v675_v62 }
  0x40   :  { %708 = vmatprep.subr.bf16.mxu1 %v707_v1 }
  0x42   :  { %678 = vmatpush3.bf16.msra.mxu0 %v677_v4 }
  0x43   :  { %710 = vmatpush3.bf16.msra.mxu1 %v709_v5 }
  0x45   :  { %352 = vmatmul.mubr.f32.vlgmr.msra.gmra.mrb[2].mxu0 %v15_v6 }
  0x46   :  { %422 = vmatmul.mubr.f32.vlgmr.msra.gmra.mrb[2].mxu1 %v17_v7 }
  0xf8   :  { %v475_v8 = vpop.f32.mrb[0].mxu0 }
  0xf9   :  { %v510_v9 = vpop.f32.mrb[0].mxu1  ;;  %v476_v10 = vpop.f32.mrb[1].mxu0 }
  0xfa   :  { %v477_v11 = vadd.f32 %v476_v10, %v475_v8  ;;  %v511_v12 = vpop.f32.mrb[1].mxu1 }
  0xfb   :  { %v512_v13 = vadd.f32 %v511_v12, %v510_v9 }
  0xfd   :  { %v284_v14 = vadd.f32 %v512_v13, %v477_v11 }
 0x118   :  { %v545_v15 = vpop.f32.mrb[2].mxu0 }
 0x119   :  { %v546_v16 = vpop.f32.mrb[3].mxu0  ;;  %v580_v17 = vpop.f32.mrb[2].mxu1 }
 0x11a   :  { %v547_v18 = vadd.f32 %v546_v16, %v545_v15  ;;  %v581_v19 = vpop.f32.mrb[3].mxu1 }
 0x11b   :  { %v582_v20 = vadd.f32 %v581_v19, %v580_v17 }
 0x11c   :  { %v354_v21 = vadd.f32 %v547_v18, %v284_v14 }
 0x11e   :  { %v424_v22 = vadd.f32 %v582_v20, %v354_v21 }
 0x120   :  { %431 = vst [vmem:[%s1139_s2] sm:$0xff] %v424_v22 }

</bundles_post_ra>
